<compile_context>
chip_gen: v7x
topology: tpu7x:2x2x1
jax: 0.10.0
libtpu: 0.0.40
codegen_flags: <defaults>
</compile_context>

<pallas_src>
import functools

import jax
import jax.numpy as jnp
from jax.experimental import pallas as pl
from jax.experimental.pallas import tpu as pltpu


def _svd_linear_kernel(x_ref, u_ref, v_ref, b_ref, o_ref, t_ref):
    # x_ref: (tm, K)  u_ref: (K, R)  v_ref: (R, tn)  b_ref: (1, tn)
    # o_ref: (tm, tn) t_ref: (tm, R) f32 scratch carried across the N axis.

    @pl.when(pl.program_id(1) == 0)
    def _():
        # Low-rank projection, computed once per M tile, f32 accumulation.
        t_ref[...] = jnp.dot(
            x_ref[...], u_ref[...], preferred_element_type=jnp.float32
        )

    # Cast the intermediate back to the operand dtype (no-op for f32) so the
    # second matmul uses the fast MXU path for bf16 weights; keep f32 acc.
    t = t_ref[...].astype(v_ref.dtype)
    y = jnp.dot(t, v_ref[...], preferred_element_type=jnp.float32)
    o_ref[...] = (y + b_ref[...].astype(jnp.float32)).astype(o_ref.dtype)


def _round_up(a, b):
    return -(-a // b) * b


def _sublane(dtype):
    # minimum second-to-last tile dim per dtype width
    return {4: 8, 2: 16, 1: 32}.get(jnp.dtype(dtype).itemsize, 8)


def _pick_tile(dim_padded, max_tile, align):
    """Largest multiple of `align` that is <= max_tile and divides dim_padded."""
    t = (min(max_tile, dim_padded) // align) * align
    while t > align:
        if dim_padded % t == 0:
            return t
        t -= align
    return align


@functools.partial(jax.jit, static_argnames=("tm", "tn", "use_pallas"))
def svd_linear(x, u, v, bias=None, *, tm=256, tn=512, use_pallas=None):
    """Forward of SVDLinear: x @ u @ v (+ bias).

    x: [..., K]; u: [K, R]; v: [R, N]; bias: [N] or None -> [..., N].
    """
    K, R = u.shape
    N = v.shape[1]
    lead = x.shape[:-1]
    x2 = x.reshape(-1, K)
    M = x2.shape[0]

    if use_pallas is None:
        # Tiny problems: fixed grid-step overhead dwarfs the work; XLA's fused
        # GEMMs win. The Pallas path pays off once M*(K+N) is bandwidth-sized.
        use_pallas = (M * (K + N)) >= (1 << 20)

    if not use_pallas:
        y = x2 @ u @ v
        if bias is not None:
            y = y + bias
        return y.astype(x.dtype).reshape(*lead, N)

    if bias is None:
        bias = jnp.zeros((N,), dtype=x.dtype)

    # ---- lane/sublane-aligned padding (wrapper-side layout plumbing) -------
    sub = _sublane(x.dtype)
    m_pad = _round_up(M, sub)
    n_pad = _round_up(N, 128)            # lane-dense output columns
    tm_eff = _pick_tile(m_pad, tm, sub)
    tn_eff = _pick_tile(n_pad, tn, 128)

    x_p = x2 if m_pad == M else jnp.pad(x2, ((0, m_pad - M), (0, 0)))
    v_p = v if n_pad == N else jnp.pad(v, ((0, 0), (0, n_pad - N)))
    b_p = (bias if n_pad == N else jnp.pad(bias, (0, n_pad - N))).reshape(1, n_pad)

    grid = (m_pad // tm_eff, n_pad // tn_eff)

    itemsize = jnp.dtype(x.dtype).itemsize
    cost = pl.CostEstimate(
        flops=2 * m_pad * R * (K + n_pad),
        transcendentals=0,
        bytes_accessed=itemsize
        * (m_pad * K + K * R + R * n_pad + n_pad + m_pad * n_pad),
    )

    out = pl.pallas_call(
        _svd_linear_kernel,
        out_shape=jax.ShapeDtypeStruct((m_pad, n_pad), x.dtype),
        grid_spec=pltpu.PrefetchScalarGridSpec(
            num_scalar_prefetch=0,
            grid=grid,
            in_specs=[
                pl.BlockSpec((tm_eff, K), lambda i, j: (i, 0)),   # x row tile
                pl.BlockSpec((K, R), lambda i, j: (0, 0)),        # U, resident
                pl.BlockSpec((R, tn_eff), lambda i, j: (0, j)),   # V column tile
                pl.BlockSpec((1, tn_eff), lambda i, j: (0, j)),   # bias tile
            ],
            out_specs=pl.BlockSpec((tm_eff, tn_eff), lambda i, j: (i, j)),
            scratch_shapes=[pltpu.VMEM((tm_eff, R), jnp.float32)],
        ),
        compiler_params=pltpu.CompilerParams(
            # The low-rank scratch is carried across the N axis -> "arbitrary";
            # M tiles are independent -> "parallel" (megacore-shardable).
            dimension_semantics=("parallel", "arbitrary"),
        ),
        cost_estimate=cost,
    )(x_p, u, v_p, b_p)

    out = out[:M, :N]
    return out.reshape(*lead, N)


def build_svd_params(key, in_features, out_features, rank, dtype=jnp.float32):
    """Deterministically build U, V, bias exactly like SVDLinear.__init__."""
    kw, kb = jax.random.split(key)
    W = jax.random.normal(kw, (out_features, in_features), jnp.float32) * 0.1
    b = jax.random.normal(kb, (out_features,), jnp.float32) * 0.1
    u_full, s, vh = jnp.linalg.svd(W.T, full_matrices=False)  # W.T: (in, out)
    sqrt_s = jnp.sqrt(s)
    U = (u_full[:, :rank] * sqrt_s[:rank]).astype(dtype)       # (in, rank)
    V = (sqrt_s[:rank, None] * vh[:rank]).astype(dtype)        # (rank, out)
    return U, V, b.astype(dtype)


if __name__ == "__main__":
    key = jax.random.PRNGKey(0)
    k1, k2, k3, k4 = jax.random.split(key, 4)

    # Case 1: module-sized tiny example (force the Pallas path to exercise it;
    # the wrapper would otherwise hand this to plain XLA).
    batch, seq, in_f, out_f, rank = 2, 8, 32, 48, 8
    x = jax.random.normal(k1, (batch, seq, in_f), dtype=jnp.float32)
    U, V, b = build_svd_params(k2, in_f, out_f, rank)
    y = jax.block_until_ready(svd_linear(x, U, V, b, use_pallas=True))
    y_ref = x @ U @ V + b
    assert y.shape == (batch, seq, out_f)
    assert jnp.allclose(y, y_ref, atol=1e-3, rtol=1e-3), "case1 mismatch"

    # Case 2: exercises M- and N-tiling plus the carried low-rank scratch.
    batch, seq, in_f, out_f, rank = 4, 64, 128, 384, 16
    x2 = jax.random.normal(k3, (batch, seq, in_f), dtype=jnp.float32)
    U2, V2, b2 = build_svd_params(k4, in_f, out_f, rank)
    y2 = jax.block_until_ready(
        svd_linear(x2, U2, V2, b2, tm=128, tn=128, use_pallas=True)
    )
    y2_ref = x2 @ U2 @ V2 + b2
    assert y2.shape == (batch, seq, out_f)
    assert jnp.allclose(y2, y2_ref, atol=1e-3, rtol=1e-3), "case2 mismatch"

    print("KERNEL_OK")
</pallas_src>

<mosaic_0001>
module attributes {stable_mosaic.version = 11 : i64} {
  func.func @_svd_linear_kernel(%arg0: i32, %arg1: i32, %arg2: memref<16x32xf32, #tpu.memory_space<vmem>>, %arg3: memref<32x8xf32, #tpu.memory_space<vmem>>, %arg4: memref<8x128xf32, #tpu.memory_space<vmem>>, %arg5: memref<1x128xf32, #tpu.memory_space<vmem>>, %arg6: memref<16x128xf32, #tpu.memory_space<vmem>>, %arg7: memref<16x8xf32, #tpu.memory_space<vmem>>) attributes {dimension_semantics = [#tpu.dimension_semantics<parallel>, #tpu.dimension_semantics<arbitrary>], iteration_bounds = array<i64: 1, 1>, scalar_prefetch = 0 : i64, scratch_operands = 1 : i64, tpu.core_type = #tpu.core_type<tc>, window_params = [{transform_indices = @transform_0, window_bounds = array<i64: 16, 32>}, {pipeline_mode = #tpu.pipeline_mode<synchronous>, transform_indices = @transform_1, window_bounds = array<i64: 32, 8>}, {transform_indices = @transform_2, window_bounds = array<i64: 8, 128>}, {transform_indices = @transform_3, window_bounds = array<i64: 1, 128>}, {transform_indices = @transform_4, window_bounds = array<i64: 16, 128>}]} {
    %c0_i32 = arith.constant 0 : i32
    %0 = arith.cmpi eq, %arg1, %c0_i32 : i32
    %1 = arith.extui %0 : i1 to i32
    %c0_i32_0 = arith.constant 0 : i32
    %2 = arith.cmpi ne, %1, %c0_i32_0 : i32
    scf.if %2 {
      %c0_8 = arith.constant 0 : index
      %c0_9 = arith.constant 0 : index
      %10 = vector.load %arg2[%c0_8, %c0_9] : memref<16x32xf32, #tpu.memory_space<vmem>>, vector<16x32xf32>
      %c0_10 = arith.constant 0 : index
      %c0_11 = arith.constant 0 : index
      %11 = vector.load %arg3[%c0_10, %c0_11] : memref<32x8xf32, #tpu.memory_space<vmem>>, vector<32x8xf32>
      %cst_12 = arith.constant dense<0.000000e+00> : vector<16x8xf32>
      %12 = tpu.matmul %10, %11, %cst_12 {dimension_numbers = #tpu.dot_dimension_numbers<[1], [0], [0], [1], [0, 0, 1, 1], [], []>} : vector<16x32xf32>, vector<32x8xf32>, vector<16x8xf32> -> vector<16x8xf32>
      %c0_13 = arith.constant 0 : index
      %c0_14 = arith.constant 0 : index
      %13 = vector.load %arg7[%c0_13, %c0_14] : memref<16x8xf32, #tpu.memory_space<vmem>>, vector<16x8xf32>
      tpu.vector_store %arg7[%c0_13, %c0_14], %12 {strides = array<i32>} : memref<16x8xf32, #tpu.memory_space<vmem>>, vector<16x8xf32>,
    } else {
    }
    %c0 = arith.constant 0 : index
    %c0_1 = arith.constant 0 : index
    %3 = vector.load %arg7[%c0, %c0_1] : memref<16x8xf32, #tpu.memory_space<vmem>>, vector<16x8xf32>
    %c0_2 = arith.constant 0 : index
    %c0_3 = arith.constant 0 : index
    %4 = vector.load %arg4[%c0_2, %c0_3] : memref<8x128xf32, #tpu.memory_space<vmem>>, vector<8x128xf32>
    %cst = arith.constant dense<0.000000e+00> : vector<16x128xf32>
    %5 = tpu.matmul %3, %4, %cst {dimension_numbers = #tpu.dot_dimension_numbers<[1], [0], [0], [1], [0, 0, 1, 1], [], []>} : vector<16x8xf32>, vector<8x128xf32>, vector<16x128xf32> -> vector<16x128xf32>
    %c0_4 = arith.constant 0 : index
    %c0_5 = arith.constant 0 : index
    %6 = vector.load %arg5[%c0_4, %c0_5] : memref<1x128xf32, #tpu.memory_space<vmem>>, vector<1x128xf32>
    %7 = vector.broadcast %6 : vector<1x128xf32> to vector<16x128xf32>
    %8 = arith.addf %5, %7 : vector<16x128xf32>
    %c0_6 = arith.constant 0 : index
    %c0_7 = arith.constant 0 : index
    %9 = vector.load %arg6[%c0_6, %c0_7] : memref<16x128xf32, #tpu.memory_space<vmem>>, vector<16x128xf32>
    tpu.vector_store %arg6[%c0_6, %c0_7], %8 {strides = array<i32>} : memref<16x128xf32, #tpu.memory_space<vmem>>, vector<16x128xf32>,
    return
  }
  func.func @transform_0(%arg0: i32, %arg1: i32) -> (i32, i32) {
    %c0_i32 = arith.constant 0 : i32
    %c0_i32_0 = arith.constant 0 : i32
    return %arg0, %c0_i32 : i32, i32
  }
  func.func @transform_1(%arg0: i32, %arg1: i32) -> (i32, i32) {
    %c0_i32 = arith.constant 0 : i32
    %c0_i32_0 = arith.constant 0 : i32
    %c0_i32_1 = arith.constant 0 : i32
    return %c0_i32, %c0_i32_0 : i32, i32
  }
  func.func @transform_2(%arg0: i32, %arg1: i32) -> (i32, i32) {
    %c0_i32 = arith.constant 0 : i32
    %c0_i32_0 = arith.constant 0 : i32
    return %c0_i32, %arg1 : i32, i32
  }
  func.func @transform_3(%arg0: i32, %arg1: i32) -> (i32, i32) {
    %c0_i32 = arith.constant 0 : i32
    %c0_i32_0 = arith.constant 0 : i32
    return %c0_i32, %arg1 : i32, i32
  }
  func.func @transform_4(%arg0: i32, %arg1: i32) -> (i32, i32) {
    %c0_i32 = arith.constant 0 : i32
    return %arg0, %arg1 : i32, i32
  }
}

</mosaic_0001>

<bundles_post_ra>
// kernel: svd_linear.1
= control target key start
LH: loop header
LB: loop body
LE: loop exit
PB: predicated region body
PF: predicated region fallthrough
CT: control target
= control target key end

     0   :  { %vm27_vm0 = vcmask 261120   ;;  %vm109_vm1 = vcmask 64512   ;;  %s303_s1 = inlined_call_operand.vmem [shape: f32[32,8], index: 1, kind: input, shape index: {}]   ;;  %s304_s0 = inlined_call_operand.vmem [shape: f32[16,32], index: 0, kind: input, shape index: {}]   ;;  %s305_s2 = inlined_call_operand.vmem [shape: f32[8,128], index: 2, kind: input, shape index: {}]   ;;  %s306_s3 = inlined_call_operand.vmem [shape: f32[1,128], index: 3, kind: input, shape index: {}]   ;;  %s307_s4 = inlined_call_operand.vmem [shape: f32[16,128], index: 4, kind: output, shape index: {}]  }
   0x1   :  { %v23_v0 = vld [vmem:[%s303_s1] sm:$0xff]  ;;  %v24_v1 = vld [vmem:[%s303_s1 + $0x8] sm:$0xff]  ;;  %v25_v2 = vld [vmem:[%s303_s1 + $0x10] sm:$0xff] }
   0x2   :  { %v240_v3 = vpack.c.bf16 %v24_v1, %v23_v0  ;;  %v26_v4 = vld [vmem:[%s303_s1 + $0x18] sm:$0xff]  ;;  %v21_v5 = vld [vmem:[%s304_s0] sm:$0xff]  ;;  %v22_v7 = vld [vmem:[%s304_s0 + $0x8] sm:$0xff] }
   0x3   :  { %v244_v6 = vpack.c.bf16 %v26_v4, %v25_v2  ;;  %232 = vmatprep.mubr.msk.f32.mxu0 %vm27_vm0, %v21_v5  ;;  %v114_v8 = vld [vmem:[%s305_s2] sm:$0xff] }
   0x4   :  { %241 = vmatprep.subr.bf16.mxu0 %v240_v3  ;;  %235 = vmatprep.subr.mxu1 %v114_v8  ;;  %v212_v13 = vld [vmem:[%s306_s3] ss:$0 sm:$0xff] }
   0x5   :  { %243 = vmatpush3.bf16.msra.mxu0 %v240_v3  ;;  %236 = vmatpush3.msra.mxu1 %v114_v8 }
   0x6   :  { %245 = vmatprep.subr.bf16.mxu0 %v244_v6 }
   0x9   :  { %247 = vmatpush3.bf16.msra.mxu0 %v244_v6 }
   0xc   :  { %233 = vmatmul.mubr.msk.f32.vlgmr.msra.gmra.mrb[0].mxu0 %vm27_vm0, %v22_v7 }
  0xdf   :  { %v234_v9 = vpop.f32.mrb[0].mxu0 }
  0xe0   :  { %111 = vst.msk [vmem:[#allocation2 + $0x8] sm:$0xff] %vm109_vm1, %v234_v9  ;;  %v100_v10 = vpop.f32.mrb[1].mxu0 }
  0xe1   :  { %110 = vst.msk [vmem:[#allocation2] sm:$0xff] %vm109_vm1, %v100_v10 }
  0xe7   :  { %v113_v12 = vld [vmem:[#allocation2 + $0x8] sm:$0xff] }
  0xe8   :  { %v112_v11 = vld [vmem:[#allocation2] sm:$0xff] }
  0xe9   :  { %237 = vmatprep.mubr.msk.f32.mxu1 %vm109_vm1, %v112_v11 }
  0xea   :  { %238 = vmatmul.mubr.msk.f32.vlgmr.msra.gmra.mrb[0].mxu1 %vm109_vm1, %v113_v12 }
 0x1bd   :  { %v239_v14 = vpop.f32.mrb[0].mxu1 }
 0x1be   :  { %v201_v15 = vadd.f32 %v239_v14, %v212_v13  ;;  %v195_v16 = vpop.f32.mrb[1].mxu1 }
 0x1bf   :  { %v196_v17 = vadd.f32 %v212_v13, %v195_v16 }
 0x1c0   :  { %205 = vst [vmem:[%s307_s4 + $0x8] sm:$0xff] %v201_v15 }
 0x1c1   :  { %204 = vst [vmem:[%s307_s4] sm:$0xff] %v196_v17 }

</bundles_post_ra>
